<compile_context>
chip_gen: v7x
topology: tpu7x:2x2x1
jax: 0.10.0
libtpu: 0.0.40
codegen_flags: <defaults>
</compile_context>

<pallas_src>
import functools

import jax
import jax.numpy as jnp
from jax.experimental import pallas as pl
from jax.experimental.pallas import tpu as pltpu


def _cdiv(a: int, b: int) -> int:
    return (a + b - 1) // b


def _round_up(x: int, m: int) -> int:
    return _cdiv(x, m) * m


def _vmem_capacity_bytes() -> int:
    """Per-core VMEM capacity; conservative (v7x-sized) default if query fails."""
    try:
        return int(pltpu.get_tpu_info().vmem_capacity_bytes)
    except Exception:
        return 64 << 20


def _vmem_limit_bytes(est_bytes: int, vmem_capacity: int) -> int:
    """Explicit scoped-VMEM request sized from the actual blocks, with margin."""
    limit = int(est_bytes * 1.3) + (2 << 20)
    limit = max(limit, 16 << 20)
    return min(limit, (vmem_capacity * 85) // 100)


def _choose_batch_tile(batch: int, row_bytes: int, fixed_bytes: int,
                       budget_bytes: int):
    """Pick (padded_batch, batch_tile).

    The tile is as large as the VMEM budget allows (amortizes per-grid-step
    overhead and redundant weight traffic), but once the padded batch reaches
    256 rows we force >= 2 tiles so the "parallel" batch axis can shard across
    v7x's two TensorCores.
    """
    bp0 = _round_up(max(batch, 8), 8)
    avail = max(budget_bytes - fixed_bytes, 8 * row_bytes)
    tb = min(bp0, 1024, max((avail // max(row_bytes, 1)) // 8 * 8, 8))
    if bp0 >= 256:
        tb = min(tb, _round_up(_cdiv(bp0, 2), 8))
    tb = max(int(tb), 8)
    bp = _round_up(bp0, tb)
    return bp, tb


# -----------------------------------------------------------------------------
# Resident-weight path: one grid axis (batch tiles), static layer unroll.
# -----------------------------------------------------------------------------
def _resident_mlp_kernel(*refs, num_layers: int, last_relu: bool):
    """One batch tile; weights resident in VMEM; static unrolled layer loop.

    refs = (x_ref, w_0..w_{L-1}, b_0..b_{L-1}, o_ref)
      x_ref : [TB, in_pad]        f32 input tile
      w_l   : [k_pad_l, n_pad_l]  compute_dtype, exact 128-aligned extents
      b_l   : [1, n_pad_l]        f32
      o_ref : [TB, out_pad]       f32 output tile
    """
    L = num_layers
    x_ref = refs[0]
    w_refs = refs[1:1 + L]
    b_refs = refs[1 + L:1 + 2 * L]
    o_ref = refs[1 + 2 * L]
    compute_dtype = w_refs[0].dtype

    h = x_ref[...].astype(compute_dtype)
    for l in range(L):
        # MXU matmul in compute_dtype, f32 accumulation; f32 epilogue.
        y = jnp.dot(h, w_refs[l][...], preferred_element_type=jnp.float32)
        y = y + b_refs[l][...]
        if l < L - 1:
            y = jnp.maximum(y, 0.0)
            h = y.astype(compute_dtype)  # resident activation in compute dtype
    if last_relu:
        y = jnp.maximum(y, 0.0)
    o_ref[...] = y.astype(o_ref.dtype)


@functools.partial(jax.jit,
                   static_argnames=("num_layers", "last_relu", "out_dim",
                                    "vmem_capacity"))
def _resident_mlp_forward(x, *wb, num_layers, last_relu, out_dim,
                          vmem_capacity):
    L = num_layers
    ws, bs = wb[:L], wb[L:]
    batch, in_dim = x.shape
    in_pad = ws[0].shape[0]
    out_pad = ws[-1].shape[1]
    csize = jnp.dtype(ws[0].dtype).itemsize
    hid_max = max(w.shape[1] for w in ws)

    # VMEM accounting: constant-index weight/bias blocks are double-buffered
    # but DMA'd only once; in/out tiles are double-buffered per batch tile;
    # live activation ~ (f32 y + compute_dtype h) per row, with slack.
    fixed = (2 * sum(int(w.size) * csize for w in ws)
             + 2 * sum(int(b.size) * 4 for b in bs))
    row_bytes = 2 * in_pad * 4 + 2 * out_pad * 4 + hid_max * (8 + csize)
    budget = (vmem_capacity * 2) // 3
    bp, tb = _choose_batch_tile(batch, row_bytes, fixed, budget)

    # Zero-pad input only to the (narrow) first-layer width; zero feature
    # padding stays exactly zero through every layer (zero weight rows/bias).
    xp = jnp.zeros((bp, in_pad), jnp.float32)
    xp = xp.at[:batch, :in_dim].set(x.astype(jnp.float32))

    in_specs = [pl.BlockSpec((tb, in_pad), lambda bi: (bi, 0))]
    for w in ws:
        kp, np_ = w.shape
        in_specs.append(pl.BlockSpec((kp, np_), lambda bi: (0, 0)))
    for b in bs:
        in_specs.append(pl.BlockSpec((1, b.shape[1]), lambda bi: (0, 0)))

    kernel = functools.partial(_resident_mlp_kernel,
                               num_layers=L, last_relu=last_relu)
    est = fixed + tb * row_bytes
    out = pl.pallas_call(
        kernel,
        out_shape=jax.ShapeDtypeStruct((bp, out_pad), jnp.float32),
        grid=(bp // tb,),
        in_specs=in_specs,
        out_specs=pl.BlockSpec((tb, out_pad), lambda bi: (bi, 0)),
        compiler_params=pltpu.CompilerParams(
            dimension_semantics=("parallel",),
            vmem_limit_bytes=_vmem_limit_bytes(est, vmem_capacity),
        ),
    )(xp, *ws, *bs)
    return out[:batch, :out_dim]


# -----------------------------------------------------------------------------
# Streaming fallback path: grid = (batch_tiles, layers), layer weights streamed.
# -----------------------------------------------------------------------------
def _streaming_mlp_kernel(x_ref, w_ref, b_ref, o_ref, h_ref, *,
                          num_layers: int, last_relu: bool,
                          in_pad: int, out_pad: int):
    """One (batch_tile, layer) grid step; layer-l weight streamed per step.

    x_ref : [TB, in_pad]   f32, same block across layers
    w_ref : [D, D]         compute_dtype, streamed + double-buffered per layer
    b_ref : [1, D]         f32
    o_ref : [TB, out_pad]  f32, written on the last layer
    h_ref : [TB, D]        compute_dtype VMEM scratch, resident across layers
    """
    l = pl.program_id(1)

    # Layer 0: seed the resident activation (narrow input, zero-filled pad).
    @pl.when(l == 0)
    def _():
        if in_pad == h_ref.shape[1]:
            h_ref[...] = x_ref[...].astype(h_ref.dtype)
        else:
            h_ref[...] = jnp.zeros_like(h_ref)
            h_ref[:, :in_pad] = x_ref[...].astype(h_ref.dtype)

    # MXU matmul (compute_dtype inputs), f32 accumulation; f32 epilogue.
    y = jnp.dot(h_ref[...], w_ref[...], preferred_element_type=jnp.float32)
    y = y + b_ref[...]

    # Hidden layers: ReLU and keep the activation resident for layer l+1.
    @pl.when(l < num_layers - 1)
    def _():
        h_ref[...] = jnp.maximum(y, 0.0).astype(h_ref.dtype)

    # Last layer: (optional ReLU) and write the narrow, lane-dense output tile.
    @pl.when(l == num_layers - 1)
    def _():
        out = jnp.maximum(y, 0.0) if last_relu else y
        o_ref[...] = out[:, :out_pad].astype(o_ref.dtype)


@functools.partial(jax.jit,
                   static_argnames=("num_layers", "last_relu", "out_dim",
                                    "vmem_capacity"))
def _streaming_mlp_forward(x, w_all, b_all, *, num_layers, last_relu, out_dim,
                           vmem_capacity):
    batch, in_dim = x.shape
    L, d, _ = w_all.shape
    assert L == num_layers
    in_pad = min(_round_up(in_dim, 128), d)
    out_pad = min(_round_up(out_dim, 128), d)
    csize = jnp.dtype(w_all.dtype).itemsize

    # Per-step VMEM: double-buffered weight/bias/x/out blocks + resident
    # compute_dtype activation scratch + the f32 matmul result.
    fixed = 2 * (d * d * csize + d * 4)
    row_bytes = 2 * in_pad * 4 + 2 * out_pad * 4 + d * csize + d * 4
    budget = (vmem_capacity * 2) // 3
    bp, tb = _choose_batch_tile(batch, row_bytes, fixed, budget)

    xp = jnp.zeros((bp, in_pad), jnp.float32)
    xp = xp.at[:batch, :in_dim].set(x.astype(jnp.float32))

    kernel = functools.partial(_streaming_mlp_kernel, num_layers=L,
                               last_relu=last_relu, in_pad=in_pad,
                               out_pad=out_pad)
    est = fixed + tb * row_bytes
    out = pl.pallas_call(
        kernel,
        out_shape=jax.ShapeDtypeStruct((bp, out_pad), jnp.float32),
        grid=(bp // tb, L),
        in_specs=[
            # Input tile: constant across the layer axis (fetched once/tile).
            pl.BlockSpec((tb, in_pad), lambda bi, l: (bi, 0)),
            # Per-layer weight: streamed + double-buffered along the layer axis.
            pl.BlockSpec((None, d, d), lambda bi, l: (l, 0, 0)),
            # Per-layer bias, pre-shaped [L, 1, D].
            pl.BlockSpec((None, 1, d), lambda bi, l: (l, 0, 0)),
        ],
        out_specs=pl.BlockSpec((tb, out_pad), lambda bi, l: (bi, 0)),
        scratch_shapes=[pltpu.VMEM((tb, d), w_all.dtype)],
        compiler_params=pltpu.CompilerParams(
            dimension_semantics=("parallel", "arbitrary"),
            vmem_limit_bytes=_vmem_limit_bytes(est, vmem_capacity),
        ),
    )(xp, w_all, b_all)
    return out[:batch, :out_dim]


# -----------------------------------------------------------------------------
# Module wrapper
# -----------------------------------------------------------------------------
class FullyConnectedPallas:
    """JAX/Pallas port of the PyTorch FullyConnected module (BN=False)."""

    def __init__(self, in_dim, out_dim, hidden_dim=1024, num_layers=6,
                 last_relu=False, BN=False, key=None,
                 compute_dtype=jnp.bfloat16, force_streaming=False):
        assert num_layers >= 1, "Number of layers must be at least 1."
        # TODO(synk): BatchNorm1d (BN=True) not implemented; default BN=False.
        assert not BN, "BN=True path not implemented in this synthetic kernel."
        self.in_dim = in_dim
        self.out_dim = out_dim
        self.hidden_dim = hidden_dim
        self.num_layers = num_layers
        self.last_relu = last_relu
        self.compute_dtype = compute_dtype
        self.vmem_capacity = _vmem_capacity_bytes()

        if key is None:
            key = jax.random.PRNGKey(0)

        # Per-layer f32 params (PyTorch nn.Linear default init); the kernels
        # use the padded copies built below.
        self.params = []           # list of (W [Din, Dout] f32, b [Dout] f32)
        layer_dims = []
        cur_dim = in_dim
        for i in range(num_layers):
            next_dim = hidden_dim if i < num_layers - 1 else out_dim
            key, kw, kb = jax.random.split(key, 3)
            bound = 1.0 / float(cur_dim) ** 0.5
            w = jax.random.uniform(kw, (cur_dim, next_dim), dtype=jnp.float32,
                                   minval=-bound, maxval=bound)
            b = jax.random.uniform(kb, (next_dim,), dtype=jnp.float32,
                                   minval=-bound, maxval=bound)
            self.params.append((w, b))
            layer_dims.append((cur_dim, next_dim))
            cur_dim = next_dim

        csize = jnp.dtype(compute_dtype).itemsize
        k_pads = [_round_up(k, 128) for k, _ in layer_dims]
        n_pads = [_round_up(n, 128) for _, n in layer_dims]

        # Resident path if the (double-buffered) per-layer-padded weight stack
        # still leaves room for activation tiles within the VMEM budget.
        budget = (self.vmem_capacity * 2) // 3
        resident_bytes = 2 * sum(kp * np_ * csize + np_ * 4
                                 for kp, np_ in zip(k_pads, n_pads))
        self.use_resident = (not force_streaming) and \
            (resident_bytes + (8 << 20) <= budget)

        if self.use_resident:
            # Each layer padded to its own 128-aligned (K, N): no D x D
            # padding waste on the first / last layers.
            self.w_list, self.b_list = [], []
            for (w, b), kp, np_ in zip(self.params, k_pads, n_pads):
                din, dout = w.shape
                wp = jnp.zeros((kp, np_), compute_dtype)
                wp = wp.at[:din, :dout].set(w.astype(compute_dtype))
                bpad = jnp.zeros((1, np_), jnp.float32).at[0, :dout].set(b)
                self.w_list.append(wp)
                self.b_list.append(bpad)
        else:
            # Streaming fallback: uniform [L, D, D] stack, one layer per grid
            # step (double-buffered layer prefetch).
            d = max(k_pads + n_pads)
            self.padded_dim = d
            w_all = jnp.zeros((num_layers, d, d), dtype=compute_dtype)
            b_all = jnp.zeros((num_layers, 1, d), dtype=jnp.float32)
            for i, (w, b) in enumerate(self.params):
                din, dout = w.shape
                w_all = w_all.at[i, :din, :dout].set(w.astype(compute_dtype))
                b_all = b_all.at[i, 0, :dout].set(b)
            self.w_all = w_all
            self.b_all = b_all

    def __call__(self, x):
        if self.use_resident:
            return _resident_mlp_forward(
                x, *self.w_list, *self.b_list,
                num_layers=self.num_layers, last_relu=self.last_relu,
                out_dim=self.out_dim, vmem_capacity=self.vmem_capacity)
        return _streaming_mlp_forward(
            x, self.w_all, self.b_all,
            num_layers=self.num_layers, last_relu=self.last_relu,
            out_dim=self.out_dim, vmem_capacity=self.vmem_capacity)


def _reference_forward(model, x):
    """Pure jnp reference mirroring the kernel's precision choices."""
    cdt = model.compute_dtype
    h = x.astype(jnp.float32)
    for i, (w, b) in enumerate(model.params):
        h = jnp.dot(h.astype(cdt), w.astype(cdt),
                    preferred_element_type=jnp.float32) + b
        if i < model.num_layers - 1 or model.last_relu:
            h = jnp.maximum(h, 0.0)
    return h


if __name__ == "__main__":
    key = jax.random.PRNGKey(0)
    key_x, key_x2, key_p = jax.random.split(key, 3)

    # Small shapes consistent with the module's forward (x: [batch, in_dim]).
    batch, in_dim, hidden_dim, out_dim, num_layers = 8, 32, 128, 32, 3
    x = jax.random.normal(key_x, (batch, in_dim), dtype=jnp.float32)

    # 1) Resident-weight path, f32 matmul -> tight check vs f32 reference.
    m1 = FullyConnectedPallas(in_dim, out_dim, hidden_dim, num_layers,
                              last_relu=False, BN=False, key=key_p,
                              compute_dtype=jnp.float32)
    assert m1.use_resident
    y1 = jax.block_until_ready(m1(x))
    r1 = _reference_forward(m1, x)
    assert y1.shape == (batch, out_dim)
    assert jnp.allclose(y1, r1, atol=1e-4, rtol=1e-4)

    # 2) Resident path, default bf16 matmul + last_relu, multi-batch-tile grid
    #    (exercises the >=2 tiles / padded-batch branch for v7x).
    batch2 = 260
    x2 = jax.random.normal(key_x2, (batch2, in_dim), dtype=jnp.float32)
    m2 = FullyConnectedPallas(in_dim, out_dim, hidden_dim, num_layers,
                              last_relu=True, BN=False, key=key_p,
                              compute_dtype=jnp.bfloat16)
    y2 = jax.block_until_ready(m2(x2))
    r2 = _reference_forward(m2, x2)
    assert y2.shape == (batch2, out_dim)
    assert jnp.allclose(y2, r2, atol=2e-2, rtol=2e-2)

    # 3) Streaming fallback path (forced), f32 -> tight check.
    m3 = FullyConnectedPallas(in_dim, out_dim, hidden_dim, num_layers,
                              last_relu=False, BN=False, key=key_p,
                              compute_dtype=jnp.float32, force_streaming=True)
    assert not m3.use_resident
    y3 = jax.block_until_ready(m3(x))
    r3 = _reference_forward(m3, x)
    assert y3.shape == (batch, out_dim)
    assert jnp.allclose(y3, r3, atol=1e-4, rtol=1e-4)

    # 4) Streaming fallback path (forced), bf16 + last_relu.
    m4 = FullyConnectedPallas(in_dim, out_dim, hidden_dim, num_layers,
                              last_relu=True, BN=False, key=key_p,
                              compute_dtype=jnp.bfloat16, force_streaming=True)
    y4 = jax.block_until_ready(m4(x))
    r4 = _reference_forward(m4, x)
    assert y4.shape == (batch, out_dim)
    assert jnp.allclose(y4, r4, atol=2e-2, rtol=2e-2)

    print("KERNEL_OK")
</pallas_src>

<mosaic_0001>
module attributes {stable_mosaic.version = 11 : i64} {
  func.func @_resident_mlp_kernel(%arg0: i32, %arg1: memref<8x128xf32, #tpu.memory_space<vmem>>, %arg2: memref<128x128xf32, #tpu.memory_space<vmem>>, %arg3: memref<128x128xf32, #tpu.memory_space<vmem>>, %arg4: memref<128x128xf32, #tpu.memory_space<vmem>>, %arg5: memref<1x128xf32, #tpu.memory_space<vmem>>, %arg6: memref<1x128xf32, #tpu.memory_space<vmem>>, %arg7: memref<1x128xf32, #tpu.memory_space<vmem>>, %arg8: memref<8x128xf32, #tpu.memory_space<vmem>>) attributes {dimension_semantics = [#tpu.dimension_semantics<parallel>], iteration_bounds = array<i64: 1>, scalar_prefetch = 0 : i64, scratch_operands = 0 : i64, tpu.core_type = #tpu.core_type<tc>, window_params = [{transform_indices = @transform_0, window_bounds = array<i64: 8, 128>}, {pipeline_mode = #tpu.pipeline_mode<synchronous>, transform_indices = @transform_1, window_bounds = array<i64: 128, 128>}, {pipeline_mode = #tpu.pipeline_mode<synchronous>, transform_indices = @transform_2, window_bounds = array<i64: 128, 128>}, {pipeline_mode = #tpu.pipeline_mode<synchronous>, transform_indices = @transform_3, window_bounds = array<i64: 128, 128>}, {pipeline_mode = #tpu.pipeline_mode<synchronous>, transform_indices = @transform_4, window_bounds = array<i64: 1, 128>}, {pipeline_mode = #tpu.pipeline_mode<synchronous>, transform_indices = @transform_5, window_bounds = array<i64: 1, 128>}, {pipeline_mode = #tpu.pipeline_mode<synchronous>, transform_indices = @transform_6, window_bounds = array<i64: 1, 128>}, {transform_indices = @transform_7, window_bounds = array<i64: 8, 128>}]} {
    %c0 = arith.constant 0 : index
    %c0_0 = arith.constant 0 : index
    %0 = vector.load %arg1[%c0, %c0_0] : memref<8x128xf32, #tpu.memory_space<vmem>>, vector<8x128xf32>
    %c0_1 = arith.constant 0 : index
    %c0_2 = arith.constant 0 : index
    %1 = vector.load %arg2[%c0_1, %c0_2] : memref<128x128xf32, #tpu.memory_space<vmem>>, vector<128x128xf32>
    %cst = arith.constant dense<0.000000e+00> : vector<8x128xf32>
    %2 = tpu.matmul %0, %1, %cst {dimension_numbers = #tpu.dot_dimension_numbers<[1], [0], [0], [1], [0, 0, 1, 1], [], []>} : vector<8x128xf32>, vector<128x128xf32>, vector<8x128xf32> -> vector<8x128xf32>
    %c0_3 = arith.constant 0 : index
    %c0_4 = arith.constant 0 : index
    %3 = vector.load %arg5[%c0_3, %c0_4] : memref<1x128xf32, #tpu.memory_space<vmem>>, vector<1x128xf32>
    %4 = vector.broadcast %3 : vector<1x128xf32> to vector<8x128xf32>
    %5 = arith.addf %2, %4 : vector<8x128xf32>
    %cst_5 = arith.constant 0.000000e+00 : f32
    %6 = vector.broadcast %cst_5 : f32 to vector<8x128xf32>
    %7 = arith.maximumf %5, %6 : vector<8x128xf32>
    %c0_6 = arith.constant 0 : index
    %c0_7 = arith.constant 0 : index
    %8 = vector.load %arg3[%c0_6, %c0_7] : memref<128x128xf32, #tpu.memory_space<vmem>>, vector<128x128xf32>
    %cst_8 = arith.constant dense<0.000000e+00> : vector<8x128xf32>
    %9 = tpu.matmul %7, %8, %cst_8 {dimension_numbers = #tpu.dot_dimension_numbers<[1], [0], [0], [1], [0, 0, 1, 1], [], []>} : vector<8x128xf32>, vector<128x128xf32>, vector<8x128xf32> -> vector<8x128xf32>
    %c0_9 = arith.constant 0 : index
    %c0_10 = arith.constant 0 : index
    %10 = vector.load %arg6[%c0_9, %c0_10] : memref<1x128xf32, #tpu.memory_space<vmem>>, vector<1x128xf32>
    %11 = vector.broadcast %10 : vector<1x128xf32> to vector<8x128xf32>
    %12 = arith.addf %9, %11 : vector<8x128xf32>
    %cst_11 = arith.constant 0.000000e+00 : f32
    %13 = vector.broadcast %cst_11 : f32 to vector<8x128xf32>
    %14 = arith.maximumf %12, %13 : vector<8x128xf32>
    %c0_12 = arith.constant 0 : index
    %c0_13 = arith.constant 0 : index
    %15 = vector.load %arg4[%c0_12, %c0_13] : memref<128x128xf32, #tpu.memory_space<vmem>>, vector<128x128xf32>
    %cst_14 = arith.constant dense<0.000000e+00> : vector<8x128xf32>
    %16 = tpu.matmul %14, %15, %cst_14 {dimension_numbers = #tpu.dot_dimension_numbers<[1], [0], [0], [1], [0, 0, 1, 1], [], []>} : vector<8x128xf32>, vector<128x128xf32>, vector<8x128xf32> -> vector<8x128xf32>
    %c0_15 = arith.constant 0 : index
    %c0_16 = arith.constant 0 : index
    %17 = vector.load %arg7[%c0_15, %c0_16] : memref<1x128xf32, #tpu.memory_space<vmem>>, vector<1x128xf32>
    %18 = vector.broadcast %17 : vector<1x128xf32> to vector<8x128xf32>
    %19 = arith.addf %16, %18 : vector<8x128xf32>
    %c0_17 = arith.constant 0 : index
    %c0_18 = arith.constant 0 : index
    %20 = vector.load %arg8[%c0_17, %c0_18] : memref<8x128xf32, #tpu.memory_space<vmem>>, vector<8x128xf32>
    tpu.vector_store %arg8[%c0_17, %c0_18], %19 {strides = array<i32>} : memref<8x128xf32, #tpu.memory_space<vmem>>, vector<8x128xf32>,
    return
  }
  func.func @transform_0(%arg0: i32) -> (i32, i32) {
    %c0_i32 = arith.constant 0 : i32
    %c0_i32_0 = arith.constant 0 : i32
    return %arg0, %c0_i32 : i32, i32
  }
  func.func @transform_1(%arg0: i32) -> (i32, i32) {
    %c0_i32 = arith.constant 0 : i32
    %c0_i32_0 = arith.constant 0 : i32
    %c0_i32_1 = arith.constant 0 : i32
    return %c0_i32, %c0_i32_0 : i32, i32
  }
  func.func @transform_2(%arg0: i32) -> (i32, i32) {
    %c0_i32 = arith.constant 0 : i32
    %c0_i32_0 = arith.constant 0 : i32
    %c0_i32_1 = arith.constant 0 : i32
    return %c0_i32, %c0_i32_0 : i32, i32
  }
  func.func @transform_3(%arg0: i32) -> (i32, i32) {
    %c0_i32 = arith.constant 0 : i32
    %c0_i32_0 = arith.constant 0 : i32
    %c0_i32_1 = arith.constant 0 : i32
    return %c0_i32, %c0_i32_0 : i32, i32
  }
  func.func @transform_4(%arg0: i32) -> (i32, i32) {
    %c0_i32 = arith.constant 0 : i32
    %c0_i32_0 = arith.constant 0 : i32
    %c0_i32_1 = arith.constant 0 : i32
    return %c0_i32, %c0_i32_0 : i32, i32
  }
  func.func @transform_5(%arg0: i32) -> (i32, i32) {
    %c0_i32 = arith.constant 0 : i32
    %c0_i32_0 = arith.constant 0 : i32
    %c0_i32_1 = arith.constant 0 : i32
    return %c0_i32, %c0_i32_0 : i32, i32
  }
  func.func @transform_6(%arg0: i32) -> (i32, i32) {
    %c0_i32 = arith.constant 0 : i32
    %c0_i32_0 = arith.constant 0 : i32
    %c0_i32_1 = arith.constant 0 : i32
    return %c0_i32, %c0_i32_0 : i32, i32
  }
  func.func @transform_7(%arg0: i32) -> (i32, i32) {
    %c0_i32 = arith.constant 0 : i32
    %c0_i32_0 = arith.constant 0 : i32
    return %arg0, %c0_i32 : i32, i32
  }
}

</mosaic_0001>

<bundles_post_ra>
// kernel: _resident_mlp_forward.1
= control target key start
LH: loop header
LB: loop body
LE: loop exit
PB: predicated region body
PF: predicated region fallthrough
CT: control target
= control target key end

     0   :  { %12 = vsyncpa [#allocation3], 0  ;;  %s856_s0 = inlined_call_operand.vmem [shape: f32[8,128], index: 0, kind: input, shape index: {}]   ;;  %s857_s1 = inlined_call_operand.hbm [shape: f32[128,128], index: 1, kind: input, shape index: {}]   ;;  %s858_s2 = inlined_call_operand.hbm [shape: f32[128,128], index: 2, kind: input, shape index: {}]   ;;  %s859_s3 = inlined_call_operand.hbm [shape: f32[128,128], index: 3, kind: input, shape index: {}]   ;;  %s860_s4 = inlined_call_operand.vmem [shape: f32[1,128], index: 4, kind: input, shape index: {}]   ;;  %s861_s5 = inlined_call_operand.vmem [shape: f32[1,128], index: 5, kind: input, shape index: {}]   ;;  %s862_s6 = inlined_call_operand.vmem [shape: f32[1,128], index: 6, kind: input, shape index: {}]   ;;  %s863_s7 = inlined_call_operand.hbm [shape: f32[8,128], index: 7, kind: output, shape index: {}]  }
   0x1   :  { %13 = vsyncpa [#allocation6], 0 }
   0x2   :  { %14 = vsyncpa [#allocation4], 0  ;;  %s701_s24 = smov [#allocation5]   ;;  %s702_s26 = smov [#allocation2]  }
   0x3   :  { %s34_s25 = sshll.u32 %s701_s24, 4  ;;  %s22_s27 = sshll.u32 %s702_s26, 4  ;;  %s35_s25 = int_to_ptr.vmem [resolvable:$true] %s34_s25  ;;  %s750_s27 = int_to_ptr.vmem [resolvable:$true] %s22_s27 }
   0x4   :  { %s607_s30 = scalar_lea.hbm %s858_s2, 2048 }
   0x5   :  { %p608_p0 = scmp.ne.s32.totalorder %s858_s2, %s607_s30  ;;  %p611_p1 = scmp.lt.u32.totalorder %s607_s30, %s858_s2 }
   0x7   :  { %p613_p2 = pnand %p611_p1, %p608_p0 }
   0x9   :  { %616 = shalt.err (!%p613_p2)
}
   0xa   :  { %s617_s12 = scalar_lea.vmem %s35_s25, 2048  ;;  %p622_p4 = scmp.lt.s32.totalorder %s35_s25, %s35_s25 }
   0xb   :  { %p618_p3 = scmp.ne.s32.totalorder %s35_s25, %s617_s12  ;;  %p623_p5 = scmp.lt.s32.totalorder %s617_s12, %s617_s12 }
   0xd   :  { %p624_p6 = por %p623_p5, %p622_p4 }
   0xf   :  { %p625_p7 = pnand %p624_p6, %p618_p3 }
  0x11   :  { %628 = shalt.err (!%p625_p7)
}
  0x12   :  { %s703_s13 = smov 128   ;;  %s704_s14 = smov 8  }
  0x13   :  { %40 = dma.hbm_to_vmem [thread:$0]  %s858_s2, 2048, %s35_s25, [#allocation6], %s703_s13, %s703_s13, %s704_s14  }
  0x14   :  { %s629_s19 = scalar_lea.hbm %s857_s1, 2048 }
  0x15   :  { %p630_p8 = scmp.ne.s32.totalorder %s857_s1, %s629_s19  ;;  %p633_p9 = scmp.lt.u32.totalorder %s629_s19, %s857_s1 }
  0x17   :  { %p635_p10 = pnand %p633_p9, %p630_p8 }
  0x19   :  { %638 = shalt.err (!%p635_p10)
}
  0x1a   :  { %s639_s24 = scalar_lea.vmem %s750_s27, 2048  ;;  %p644_p12 = scmp.lt.s32.totalorder %s750_s27, %s750_s27 }
  0x1b   :  { %p640_p11 = scmp.ne.s32.totalorder %s750_s27, %s639_s24  ;;  %p645_p13 = scmp.lt.s32.totalorder %s639_s24, %s639_s24 }
  0x1d   :  { %p646_p0 = por %p645_p13, %p644_p12 }
  0x1f   :  { %p647_p1 = pnand %p646_p0, %p640_p11 }
  0x21   :  { %650 = shalt.err (!%p647_p1)
}
  0x22   :  { %28 = dma.hbm_to_vmem [thread:$0]  %s857_s1, 2048, %s750_s27, [#allocation3], %s703_s13, %s703_s13, %s704_s14  }
  0x23   :  { %s705_s26 = smov [#allocation7]   ;;  %s651_s8 = scalar_lea.hbm %s859_s3, 2048 }
  0x24   :  { %s46_s28 = sshll.u32 %s705_s26, 4  ;;  %p652_p2 = scmp.ne.s32.totalorder %s859_s3, %s651_s8  ;;  %s47_s28 = int_to_ptr.vmem [resolvable:$true] %s46_s28 }
  0x25   :  { %p655_p3 = scmp.lt.u32.totalorder %s651_s8, %s859_s3 }
  0x27   :  { %p657_p4 = pnand %p655_p3, %p652_p2 }
  0x29   :  { %660 = shalt.err (!%p657_p4)
}
  0x2a   :  { %s661_s15 = scalar_lea.vmem %s47_s28, 2048  ;;  %p666_p6 = scmp.lt.s32.totalorder %s47_s28, %s47_s28 }
  0x2b   :  { %p662_p5 = scmp.ne.s32.totalorder %s47_s28, %s661_s15  ;;  %p667_p7 = scmp.lt.s32.totalorder %s661_s15, %s661_s15 }
  0x2d   :  { %p668_p8 = por %p667_p7, %p666_p6 }
  0x2f   :  { %p669_p9 = pnand %p668_p8, %p662_p5 }
  0x31   :  { %672 = shalt.err (!%p669_p9)
}
  0x32   :  { %52 = dma.hbm_to_vmem [thread:$0]  %s859_s3, 2048, %s47_s28, [#allocation6], %s703_s13, %s703_s13, %s704_s14  }
  0x33   :  { %695 = dma.done.wait [#allocation3], 2048  }
  0x34   :  { %696 = vsyncadd [#allocation3], 4294965248 }
  0x35   :  { %697 = dma.done.wait [#allocation6], 4096  }
  0x36   :  { %698 = vsyncadd [#allocation6], 4294963200  ;;  %v706_v0 = vmov 0.0|0.0   ;;  %vm707_vm0 = vmmov 0   ;;  %v708_v1 = vmov 0.0   ;;  %v69_v2 = vld [vmem:[#allocation2] sm:$0xff] }
  0x37   :  { %526 = vmatprep.subr.bf16.mxu0 %v706_v0  ;;  %453 = vmatprep.mubr.msk.f32.mxu0 %vm707_vm0, %v708_v1  ;;  %v70_v3 = vld [vmem:[#allocation2 + $0x8] sm:$0xff]  ;;  %v71_v4 = vld [vmem:[#allocation2 + $0x10] sm:$0xff]  ;;  %v72_v6 = vld [vmem:[#allocation2 + $0x18] sm:$0xff]  ;;  %s709_s19 = smov [#allocation8]  }
  0x38   :  { %550 = vmatprep.subr.bf16.mxu1 %v706_v0  ;;  %488 = vmatprep.mubr.msk.f32.mxu1 %vm707_vm0, %v708_v1  ;;  %v527_v5 = vpack.c.bf16 %v70_v3, %v69_v2  ;;  %v530_v7 = vpack.c.bf16 %v72_v6, %v71_v4  ;;  %v73_v8 = vld [vmem:[#allocation2 + $0x20] sm:$0xff]  ;;  %v74_v9 = vld [vmem:[#allocation2 + $0x28] sm:$0xff]  ;;  %v165_v12 = vld [vmem:[#allocation5 + $0x10] sm:$0xff]  ;;  %s357_s20 = sshll.u32 %s709_s19, 4  ;;  %s358_s20 = int_to_ptr.vmem [resolvable:$true] %s357_s20 }
  0x39   :  { %v163_v10 = vld [vmem:[#allocation5] sm:$0xff]  ;;  %v164_v11 = vld [vmem:[#allocation5 + $0x8] sm:$0xff]  ;;  %v166_v13 = vld [vmem:[#allocation5 + $0x18] sm:$0xff]  ;;  %v533_v14 = vpack.c.bf16 %v74_v9, %v73_v8  ;;  %s673_s21 = scalar_lea.vmem %s358_s20, 128  ;;  %p678_p11 = scmp.lt.s32.totalorder %s358_s20, %s358_s20 }
  0x3a   :  { %528 = vmatpush3.bf16.msra.mxu0 %v527_v5  ;;  %v551_v15 = vpack.c.bf16 %v164_v11, %v163_v10  ;;  %v75_v16 = vld [vmem:[#allocation2 + $0x30] sm:$0xff]  ;;  %v76_v17 = vld [vmem:[#allocation2 + $0x38] sm:$0xff]  ;;  %v554_v18 = vpack.c.bf16 %v166_v13, %v165_v12  ;;  %v167_v19 = vld [vmem:[#allocation5 + $0x20] sm:$0xff]  ;;  %p674_p10 = scmp.ne.s32.totalorder %s358_s20, %s673_s21  ;;  %p679_p12 = scmp.lt.s32.totalorder %s673_s21, %s673_s21 }
  0x3b   :  { %529 = vmatprep.subr.bf16.mxu0 %v706_v0  ;;  %v168_v20 = vld [vmem:[#allocation5 + $0x28] sm:$0xff]  ;;  %v536_v21 = vpack.c.bf16 %v76_v17, %v75_v16  ;;  %v77_v22 = vld [vmem:[#allocation2 + $0x40] sm:$0xff]  ;;  %v169_v25 = vld [vmem:[#allocation5 + $0x30] sm:$0xff] }
  0x3c   :  { %552 = vmatpush3.bf16.msra.mxu1 %v551_v15  ;;  %v78_v23 = vld [vmem:[#allocation2 + $0x48] sm:$0xff]  ;;  %v557_v24 = vpack.c.bf16 %v168_v20, %v167_v19  ;;  %v170_v26 = vld [vmem:[#allocation5 + $0x38] sm:$0xff]  ;;  %v79_v28 = vld [vmem:[#allocation2 + $0x50] sm:$0xff]  ;;  %p680_p13 = por %p679_p12, %p678_p11 }
  0x3d   :  { %553 = vmatprep.subr.bf16.mxu1 %v706_v0  ;;  %v539_v27 = vpack.c.bf16 %v78_v23, %v77_v22  ;;  %v80_v29 = vld [vmem:[#allocation2 + $0x58] sm:$0xff]  ;;  %v560_v30 = vpack.c.bf16 %v170_v26, %v169_v25  ;;  %v171_v31 = vld [vmem:[#allocation5 + $0x40] sm:$0xff]  ;;  %v172_v32 = vld [vmem:[#allocation5 + $0x48] sm:$0xff] }
  0x3e   :  { %531 = vmatpush3.bf16.msra.mxu0 %v530_v7  ;;  %v542_v33 = vpack.c.bf16 %v80_v29, %v79_v28  ;;  %v81_v34 = vld [vmem:[#allocation2 + $0x60] sm:$0xff]  ;;  %v82_v35 = vld [vmem:[#allocation2 + $0x68] sm:$0xff]  ;;  %v563_v36 = vpack.c.bf16 %v172_v32, %v171_v31  ;;  %v173_v37 = vld [vmem:[#allocation5 + $0x50] sm:$0xff]  ;;  %p681_p0 = pnand %p680_p13, %p674_p10 }
  0x3f   :  { %532 = vmatprep.subr.bf16.mxu0 %v706_v0  ;;  %v174_v38 = vld [vmem:[#allocation5 + $0x58] sm:$0xff]  ;;  %v545_v39 = vpack.c.bf16 %v82_v35, %v81_v34  ;;  %v83_v40 = vld [vmem:[#allocation2 + $0x70] sm:$0xff]  ;;  %v175_v43 = vld [vmem:[#allocation5 + $0x60] sm:$0xff] }
  0x40   :  { %555 = vmatpush3.bf16.msra.mxu1 %v554_v18  ;;  %v84_v41 = vld [vmem:[#allocation2 + $0x78] sm:$0xff]  ;;  %v566_v42 = vpack.c.bf16 %v174_v38, %v173_v37  ;;  %v176_v44 = vld [vmem:[#allocation5 + $0x68] sm:$0xff]  ;;  %v68_v47 = vld [vmem:[%s856_s0] sm:$0xff] }
  0x41   :  { %556 = vmatprep.subr.bf16.mxu1 %v706_v0  ;;  %v548_v45 = vpack.c.bf16 %v84_v41, %v83_v40  ;;  %v569_v46 = vpack.c.bf16 %v176_v44, %v175_v43  ;;  %v177_v48 = vld [vmem:[#allocation5 + $0x70] sm:$0xff]  ;;  %v178_v49 = vld [vmem:[#allocation5 + $0x78] sm:$0xff]  ;;  %v257_v51 = vld [vmem:[#allocation7] sm:$0xff] }
  0x42   :  { %534 = vmatpush3.bf16.msra.mxu0 %v533_v14  ;;  %v572_v50 = vpack.c.bf16 %v178_v49, %v177_v48  ;;  %v258_v52 = vld [vmem:[#allocation7 + $0x8] sm:$0xff]  ;;  %v259_v53 = vld [vmem:[#allocation7 + $0x10] sm:$0xff]  ;;  %v260_v55 = vld [vmem:[#allocation7 + $0x18] sm:$0xff] }
  0x43   :  { %535 = vmatprep.subr.bf16.mxu0 %v706_v0  ;;  %v575_v54 = vpack.c.bf16 %v258_v52, %v257_v51  ;;  %v578_v56 = vpack.c.bf16 %v260_v55, %v259_v53  ;;  %v261_v57 = vld [vmem:[#allocation7 + $0x20] sm:$0xff]  ;;  %v262_v58 = vld [vmem:[#allocation7 + $0x28] sm:$0xff]  ;;  %v263_v60 = vld [vmem:[#allocation7 + $0x30] sm:$0xff] }
  0x44   :  { %558 = vmatpush3.bf16.msra.mxu1 %v557_v24  ;;  %v581_v59 = vpack.c.bf16 %v262_v58, %v261_v57  ;;  %v264_v61 = vld [vmem:[#allocation7 + $0x38] sm:$0xff]  ;;  %v265_v63 = vld [vmem:[#allocation7 + $0x40] sm:$0xff]  ;;  %v267_v3 = vld [vmem:[#allocation7 + $0x50] sm:$0xff] }
  0x45   :  { %559 = vmatprep.subr.bf16.mxu1 %v706_v0  ;;  %v584_v62 = vpack.c.bf16 %v264_v61, %v263_v60  ;;  %v268_v4 = vld [vmem:[#allocation7 + $0x58] sm:$0xff]  ;;  %v269_v6 = vld [vmem:[#allocation7 + $0x60] sm:$0xff]  ;;  %v270_v7 = vld [vmem:[#allocation7 + $0x68] sm:$0xff] }
  0x46   :  { %537 = vmatpush3.bf16.msra.mxu0 %v536_v21  ;;  %v590_v5 = vpack.c.bf16 %v268_v4, %v267_v3  ;;  %v593_v8 = vpack.c.bf16 %v270_v7, %v269_v6  ;;  %v367_v9 = vld [vmem:[%s860_s4] ss:$0 sm:$0xff]  ;;  %v271_v14 = vld [vmem:[#allocation7 + $0x70] sm:$0xff]  ;;  %v272_v15 = vld [vmem:[#allocation7 + $0x78] sm:$0xff] }
  0x47   :  { %538 = vmatprep.subr.bf16.mxu0 %v706_v0  ;;  %v596_v16 = vpack.c.bf16 %v272_v15, %v271_v14  ;;  %v368_v17 = vld [vmem:[%s861_s5] ss:$0 sm:$0xff] }
  0x48   :  { %561 = vmatpush3.bf16.msra.mxu1 %v560_v30  ;;  %v369_v21 = vld [vmem:[%s862_s6] ss:$0 sm:$0xff] }
  0x49   :  { %562 = vmatprep.subr.bf16.mxu1 %v706_v0 }
  0x4a   :  { %540 = vmatpush3.bf16.msra.mxu0 %v539_v27 }
  0x4b   :  { %541 = vmatprep.subr.bf16.mxu0 %v706_v0 }
  0x4c   :  { %564 = vmatpush3.bf16.msra.mxu1 %v563_v36 }
  0x4d   :  { %565 = vmatprep.subr.bf16.mxu1 %v706_v0 }
  0x4e   :  { %543 = vmatpush3.bf16.msra.mxu0 %v542_v33 }
  0x4f   :  { %544 = vmatprep.subr.bf16.mxu0 %v706_v0 }
  0x50   :  { %567 = vmatpush3.bf16.msra.mxu1 %v566_v42 }
  0x51   :  { %568 = vmatprep.subr.bf16.mxu1 %v706_v0 }
  0x52   :  { %546 = vmatpush3.bf16.msra.mxu0 %v545_v39 }
  0x53   :  { %547 = vmatprep.subr.bf16.mxu0 %v706_v0 }
  0x54   :  { %570 = vmatpush3.bf16.msra.mxu1 %v569_v46 }
  0x55   :  { %571 = vmatprep.subr.bf16.mxu1 %v706_v0 }
  0x56   :  { %549 = vmatpush3.bf16.msra.mxu0 %v548_v45 }
  0x57   :  { %574 = vmatprep.subr.bf16.mxu0 %v706_v0 }
  0x58   :  { %573 = vmatpush3.bf16.msra.mxu1 %v572_v50 }
  0x59   :  { %454 = vmatmul.mubr.f32.vlgmr.msra.gmra.mrb[0].mxu0 %v68_v47 }
  0x5a   :  { %523 = vmatprep.mubr.msk.f32.mxu0 %vm707_vm0, %v708_v1  ;;  %576 = vmatpush3.bf16.msra.mxu0 %v575_v54  ;;  %v266_v1 = vld [vmem:[#allocation7 + $0x48] sm:$0xff] }
  0x5b   :  { %577 = vmatprep.subr.bf16.mxu0 %v706_v0  ;;  %v587_v2 = vpack.c.bf16 %v266_v1, %v265_v63 }
  0x5e   :  { %579 = vmatpush3.bf16.msra.mxu0 %v578_v56 }
  0x5f   :  { %580 = vmatprep.subr.bf16.mxu0 %v706_v0 }
  0x62   :  { %582 = vmatpush3.bf16.msra.mxu0 %v581_v59 }
  0x63   :  { %583 = vmatprep.subr.bf16.mxu0 %v706_v0 }
  0x66   :  { %585 = vmatpush3.bf16.msra.mxu0 %v584_v62 }
  0x67   :  { %586 = vmatprep.subr.bf16.mxu0 %v706_v0 }
  0x6a   :  { %588 = vmatpush3.bf16.msra.mxu0 %v587_v2 }
  0x6b   :  { %589 = vmatprep.subr.bf16.mxu0 %v706_v0 }
  0x6e   :  { %591 = vmatpush3.bf16.msra.mxu0 %v590_v5 }
  0x6f   :  { %592 = vmatprep.subr.bf16.mxu0 %v706_v0 }
  0x72   :  { %594 = vmatpush3.bf16.msra.mxu0 %v593_v8 }
  0x73   :  { %595 = vmatprep.subr.bf16.mxu0 %v706_v0 }
  0x76   :  { %597 = vmatpush3.bf16.msra.mxu0 %v596_v16 }
 0x12c   :  { %v158_v10 = vpop.f32.mrb[0].mxu0 }
 0x12d   :  { %v159_v11 = vadd.f32 %v367_v9, %v158_v10  ;;  %v455_v12 = vpop.f32.mrb[1].mxu0 }
 0x12f   :  { %v162_v13 = vmax.f32 %v159_v11, 0.0 }
 0x131   :  { %489 = vmatmul.mubr.f32.vlgmr.msra.gmra.mrb[0].mxu1 %v162_v13 }
 0x204   :  { %v252_v18 = vpop.f32.mrb[0].mxu1 }
 0x205   :  { %v253_v19 = vadd.f32 %v368_v17, %v252_v18  ;;  %v490_v0 = vpop.f32.mrb[1].mxu1 }
 0x207   :  { %v256_v20 = vmax.f32 %v253_v19, 0.0 }
 0x209   :  { %524 = vmatmul.mubr.f32.vlgmr.msra.gmra.mrb[2].mxu0 %v256_v20 }
 0x2dc   :  { %v346_v22 = vpop.f32.mrb[2].mxu0 }
 0x2dd   :  { %v347_v23 = vadd.f32 %v369_v21, %v346_v22  ;;  %v525_v24 = vpop.f32.mrb[3].mxu0 }
 0x2df   :  { %350 = vst [vmem:[#allocation8] sm:$0xff] %v347_v23 }
 0x2e0   :  { %684 = shalt.err (!%p681_p0)
}
 0x2e1   :  { %s685_s23 = scalar_lea.hbm %s863_s7, 128 }
 0x2e2   :  { %p686_p1 = scmp.ne.s32.totalorder %s863_s7, %s685_s23  ;;  %p689_p2 = scmp.lt.u32.totalorder %s685_s23, %s863_s7 }
 0x2e4   :  { %p691_p3 = pnand %p689_p2, %p686_p1 }
 0x2e6   :  { %694 = shalt.err (!%p691_p3)
}
 0x2e7   :  { %360 = dma.vmem_to_hbm [thread:$0]  %s358_s20, 128, %s863_s7, [#allocation4]  }
 0x2e8   :  { %699 = dma.done.wait [#allocation4], 128  }
 0x2e9   :  { %700 = vsyncadd [#allocation4], 4294967168 }
 0x2ea   :  { %364 = vsyncpa [#allocation3], 1 }
 0x2eb   :  { %365 = vsyncpa [#allocation6], 1 }
 0x2ec   :  { %366 = vsyncpa [#allocation4], 1 }

</bundles_post_ra>
